<compile_context>
chip_gen: v7x
topology: tpu7x:2x2x1
jax: 0.10.0
libtpu: 0.0.40
codegen_flags: <defaults>
</compile_context>

<pallas_src>
import jax
import jax.numpy as jnp
from jax import lax
from jax.experimental import pallas as pl
from jax.experimental.pallas import tpu as pltpu

LANE = 128
SUBLANE = 8
ROW_ALIGN = 32  # sublane multiple that is legal for f32 (8), bf16 (16) and int8 (32)


def _chip_defaults():
    """(bytes per input tile, tensorcores per chip), chosen at trace time."""
    try:
        kind = jax.devices()[0].device_kind.lower()
    except Exception:
        kind = ""
    if "v7" in kind or "7x" in kind:
        return 4 << 20, 2     # ~4 MiB tiles; megacore split across the 2 TCs
    return 2 << 20, 1         # v5e / v6e / unknown: ~2 MiB tiles, single TC


def _make_mse_kernel(*, row_tile, tail_rows, total_blocks, n_cores, has_dup):
    last = total_blocks - 1

    def accum(p_ref, t_ref, o_ref, mask_rows):
        d = p_ref[...].astype(jnp.float32) - t_ref[...].astype(jnp.float32)
        sq = d * d
        if mask_rows is not None:
            # Row-level mask: only rows >= mask_rows (the region Pallas leaves
            # undefined in the partial tail block) are zeroed.
            row_ids = lax.broadcasted_iota(jnp.int32, (row_tile, LANE), 0)
            sq = jnp.where(row_ids < mask_rows, sq, 0.0)
        # Lane/sublane-parallel accumulation: reduce only the leading (non-vreg)
        # axis, keeping 8x128 = 1024 independent partial sums (pure VPU adds).
        o_ref[0] += sq.reshape(row_tile // SUBLANE, SUBLANE, LANE).sum(axis=0)

    def kernel(p_ref, t_ref, o_ref):
        i = pl.program_id(1)
        gb = (pl.program_id(0) * pl.num_programs(1) + i) if n_cores > 1 else i

        @pl.when(i == 0)
        def _():
            o_ref[...] = jnp.zeros_like(o_ref)

        if tail_rows == 0:
            if has_dup:
                @pl.when(gb < total_blocks)
                def _():
                    accum(p_ref, t_ref, o_ref, None)
            else:
                accum(p_ref, t_ref, o_ref, None)
        else:
            if total_blocks > 1:
                @pl.when(gb < last)
                def _():
                    accum(p_ref, t_ref, o_ref, None)

            @pl.when(gb == last)
            def _():
                accum(p_ref, t_ref, o_ref, tail_rows)
            # gb > last (clamped duplicate blocks) contribute nothing.

    return kernel


def sigmoid_mae_loss(pred, target, *, tile_bytes=None):
    """Equivalent of SigmoidMAELoss.forward: mean((pred - target) ** 2)."""
    assert pred.shape == target.shape, (pred.shape, target.shape)
    n_elems = pred.size
    if n_elems == 0:
        # torch MSELoss with mean reduction on empty input yields NaN.
        return jnp.float32(jnp.nan)

    p_flat = jnp.ravel(pred)
    t_flat = jnp.ravel(target)

    rows_main = n_elems // LANE
    rem = n_elems - rows_main * LANE

    total = jnp.float32(0.0)
    if rows_main > 0:
        default_bytes, n_cores = _chip_defaults()
        bytes_per_tile = default_bytes if tile_bytes is None else int(tile_bytes)
        itemsize = max(int(jnp.dtype(pred.dtype).itemsize), 1)

        # Tile: large for the HBM roofline, constant bytes/step across dtypes,
        # multiple of 32 rows, never (much) bigger than the data itself.
        row_tile = max(ROW_ALIGN, bytes_per_tile // (LANE * itemsize))
        row_tile = (row_tile // ROW_ALIGN) * ROW_ALIGN
        row_tile = min(row_tile, pl.cdiv(rows_main, ROW_ALIGN) * ROW_ALIGN)

        total_blocks = pl.cdiv(rows_main, row_tile)
        if total_blocks < n_cores:
            n_cores = 1  # not enough blocks to split across cores
        blocks_per_core = pl.cdiv(total_blocks, n_cores)
        has_dup = n_cores * blocks_per_core > total_blocks
        tail_rows = rows_main % row_tile  # 0 => every block is full

        # Lane-aligned prefix only; no padded copies of the inputs.
        p_main = p_flat[: rows_main * LANE].reshape(rows_main, LANE)
        t_main = t_flat[: rows_main * LANE].reshape(rows_main, LANE)

        if n_cores > 1:
            def in_map(c, i):
                # Clamp so past-the-end (duplicate) steps re-read the last valid
                # block; the in-kernel pl.when drops their contribution.
                return (jnp.minimum(c * blocks_per_core + i, total_blocks - 1), 0)
        else:
            def in_map(c, i):
                return (i, 0)

        kernel = _make_mse_kernel(
            row_tile=row_tile, tail_rows=tail_rows, total_blocks=total_blocks,
            n_cores=n_cores, has_dup=has_dup)

        partials = pl.pallas_call(
            kernel,
            out_shape=jax.ShapeDtypeStruct((n_cores, SUBLANE, LANE), jnp.float32),
            grid_spec=pltpu.PrefetchScalarGridSpec(
                num_scalar_prefetch=0,
                grid=(n_cores, blocks_per_core),
                in_specs=[
                    pl.BlockSpec((row_tile, LANE), in_map),
                    pl.BlockSpec((row_tile, LANE), in_map),
                ],
                out_specs=pl.BlockSpec((1, SUBLANE, LANE), lambda c, i: (c, 0, 0)),
            ),
            compiler_params=pltpu.CompilerParams(
                dimension_semantics=("parallel", "arbitrary"),
            ),
        )(p_main, t_main)
        total = jnp.sum(partials)

    if rem:
        # <128-element lane remainder: tiny plain-jnp epilogue.
        p_tail = p_flat[rows_main * LANE:].astype(jnp.float32)
        t_tail = t_flat[rows_main * LANE:].astype(jnp.float32)
        total = total + jnp.sum((p_tail - t_tail) ** 2)

    return total / jnp.float32(n_elems)


if __name__ == "__main__":
    key = jax.random.PRNGKey(0)
    k1, k2 = jax.random.split(key)

    # Small NCHW-like shapes consistent with the module's usage.
    pred = jax.random.normal(k1, (2, 4, 16, 16), dtype=jnp.float32)
    target = jax.random.normal(k2, (2, 4, 16, 16), dtype=jnp.float32)
    loss = sigmoid_mae_loss(pred, target)
    jax.block_until_ready(loss)
    ref = jnp.mean((pred - target) ** 2)
    assert jnp.allclose(loss, ref, rtol=1e-5, atol=1e-5), (loss, ref)

    # Non-lane-aligned size: exercises the wrapper-side remainder epilogue + tail mask.
    p2 = jax.random.normal(k1, (3, 5, 7, 11), dtype=jnp.float32)
    t2 = jax.random.normal(k2, (3, 5, 7, 11), dtype=jnp.float32)
    loss2 = sigmoid_mae_loss(p2, t2)
    jax.block_until_ready(loss2)
    ref2 = jnp.mean((p2 - t2) ** 2)
    assert jnp.allclose(loss2, ref2, rtol=1e-5, atol=1e-5), (loss2, ref2)

    # Multi-block path (unmasked interior blocks + masked tail block + remainder),
    # forced via a deliberately tiny tile override.
    p3 = jax.random.normal(k1, (2, 4, 100, 130), dtype=jnp.float32)
    t3 = jax.random.normal(k2, (2, 4, 100, 130), dtype=jnp.float32)
    loss3 = sigmoid_mae_loss(p3, t3, tile_bytes=32 * LANE * 4)
    jax.block_until_ready(loss3)
    ref3 = jnp.mean((p3 - t3) ** 2)
    assert jnp.allclose(loss3, ref3, rtol=1e-5, atol=1e-5), (loss3, ref3)

    # bf16 inputs: streamed in bf16, upcast to f32 inside the kernel.
    pb = jax.random.normal(k1, (2, 4, 16, 16), dtype=jnp.bfloat16)
    tb = jax.random.normal(k2, (2, 4, 16, 16), dtype=jnp.bfloat16)
    loss4 = sigmoid_mae_loss(pb, tb)
    jax.block_until_ready(loss4)
    ref4 = jnp.mean((pb.astype(jnp.float32) - tb.astype(jnp.float32)) ** 2)
    assert jnp.allclose(loss4, ref4, rtol=1e-5, atol=1e-5), (loss4, ref4)

    print("KERNEL_OK")
</pallas_src>

<mosaic_0001>
module attributes {stable_mosaic.version = 11 : i64} {
  func.func @kernel(%arg0: i32, %arg1: i32, %arg2: memref<32x128xf32, #tpu.memory_space<vmem>>, %arg3: memref<32x128xf32, #tpu.memory_space<vmem>>, %arg4: memref<1x8x128xf32, #tpu.memory_space<vmem>>) attributes {dimension_semantics = [#tpu.dimension_semantics<parallel>, #tpu.dimension_semantics<arbitrary>], iteration_bounds = array<i64: 1, 1>, scalar_prefetch = 0 : i64, scratch_operands = 0 : i64, tpu.core_type = #tpu.core_type<tc>, window_params = [{transform_indices = @transform_0, window_bounds = array<i64: 32, 128>}, {transform_indices = @transform_1, window_bounds = array<i64: 32, 128>}, {transform_indices = @transform_2, window_bounds = array<i64: 1, 8, 128>}]} {
    %c0_i32 = arith.constant 0 : i32
    %0 = arith.cmpi eq, %arg1, %c0_i32 : i32
    %1 = arith.extui %0 : i1 to i32
    %c0_i32_0 = arith.constant 0 : i32
    %2 = arith.cmpi ne, %1, %c0_i32_0 : i32
    scf.if %2 {
      %cst = arith.constant 0.000000e+00 : f32
      %6 = vector.broadcast %cst : f32 to vector<1x8x128xf32>
      %c0 = arith.constant 0 : index
      %c0_3 = arith.constant 0 : index
      %c0_4 = arith.constant 0 : index
      %7 = vector.load %arg4[%c0, %c0_3, %c0_4] : memref<1x8x128xf32, #tpu.memory_space<vmem>>, vector<1x8x128xf32>
      tpu.vector_store %arg4[%c0, %c0_3, %c0_4], %6 {strides = array<i32>} : memref<1x8x128xf32, #tpu.memory_space<vmem>>, vector<1x8x128xf32>,
    } else {
    }
    %c0_i32_1 = arith.constant 0 : i32
    %3 = arith.cmpi eq, %arg1, %c0_i32_1 : i32
    %4 = arith.extui %3 : i1 to i32
    %c0_i32_2 = arith.constant 0 : i32
    %5 = arith.cmpi ne, %4, %c0_i32_2 : i32
    scf.if %5 {
      %c0 = arith.constant 0 : index
      %c0_3 = arith.constant 0 : index
      %6 = vector.load %arg2[%c0, %c0_3] : memref<32x128xf32, #tpu.memory_space<vmem>>, vector<32x128xf32>
      %c0_4 = arith.constant 0 : index
      %c0_5 = arith.constant 0 : index
      %7 = vector.load %arg3[%c0_4, %c0_5] : memref<32x128xf32, #tpu.memory_space<vmem>>, vector<32x128xf32>
      %8 = arith.subf %6, %7 : vector<32x128xf32>
      %9 = arith.mulf %8, %8 : vector<32x128xf32>
      %10 = tpu.iota {dimensions = array<i32: 0>} : vector<32x128xi32>
      %c16_i32 = arith.constant 16 : i32
      %11 = vector.broadcast %c16_i32 : i32 to vector<32x128xi32>
      %12 = arith.cmpi slt, %10, %11 : vector<32x128xi32>
      %cst = arith.constant 0.000000e+00 : f32
      %13 = vector.broadcast %cst : f32 to vector<32x128xf32>
      %14 = arith.select %12, %9, %13 : vector<32x128xi1>, vector<32x128xf32>
      %c0_6 = arith.constant 0 : index
      %c0_7 = arith.constant 0 : index
      %c0_8 = arith.constant 0 : index
      %15 = vector.load %arg4[%c0_6, %c0_7, %c0_8] : memref<1x8x128xf32, #tpu.memory_space<vmem>>, vector<1x8x128xf32>
      %16 = vector.shape_cast %15 : vector<1x8x128xf32> to vector<8x128xf32>
      %17 = vector.shape_cast %14 : vector<32x128xf32> to vector<4x8x128xf32>
      %cst_9 = arith.constant dense<0.000000e+00> : vector<8x128xf32>
      %18 = vector.multi_reduction <add>, %17, %cst_9 [0] : vector<4x8x128xf32> to vector<8x128xf32>
      %19 = arith.addf %16, %18 : vector<8x128xf32>
      %c0_10 = arith.constant 0 : index
      %c0_11 = arith.constant 0 : index
      %c0_12 = arith.constant 0 : index
      %20 = vector.load %arg4[%c0_10, %c0_11, %c0_12] : memref<1x8x128xf32, #tpu.memory_space<vmem>>, vector<1x8x128xf32>
      %21 = vector.shape_cast %20 : vector<1x8x128xf32> to vector<8x128xf32>
      %22 = vector.shape_cast %19 : vector<8x128xf32> to vector<1x8x128xf32>
      tpu.vector_store %arg4[%c0_10, %c0_11, %c0_12], %22 {strides = array<i32>} : memref<1x8x128xf32, #tpu.memory_space<vmem>>, vector<1x8x128xf32>,
    } else {
    }
    return
  }
  func.func @transform_0(%arg0: i32, %arg1: i32) -> (i32, i32) {
    %c0_i32 = arith.constant 0 : i32
    %c0_i32_0 = arith.constant 0 : i32
    return %arg1, %c0_i32 : i32, i32
  }
  func.func @transform_1(%arg0: i32, %arg1: i32) -> (i32, i32) {
    %c0_i32 = arith.constant 0 : i32
    %c0_i32_0 = arith.constant 0 : i32
    return %arg1, %c0_i32 : i32, i32
  }
  func.func @transform_2(%arg0: i32, %arg1: i32) -> (i32, i32, i32) {
    %c0_i32 = arith.constant 0 : i32
    %c0_i32_0 = arith.constant 0 : i32
    %c0_i32_1 = arith.constant 0 : i32
    return %arg0, %c0_i32, %c0_i32_0 : i32, i32, i32
  }
}

</mosaic_0001>

<bundles_post_ra>
// kernel: tpu_custom_call.1
= control target key start
LH: loop header
LB: loop body
LE: loop exit
PB: predicated region body
PF: predicated region fallthrough
CT: control target
= control target key end

     0   :  { %7 = vsyncpa [#allocation3], 0  ;;  %s230_s0 = inlined_call_operand.hbm [shape: f32[16,128], index: 0, kind: input, shape index: {}]   ;;  %s231_s1 = inlined_call_operand.hbm [shape: f32[16,128], index: 1, kind: input, shape index: {}]   ;;  %s232_s2 = inlined_call_operand.hbm [shape: f32[1,8,128], index: 2, kind: output, shape index: {}]  }
   0x1   :  { %8 = vsyncpa [#allocation6], 0 }
   0x2   :  { %9 = vsyncpa [#allocation4], 0 }
   0x3   :  { %14 = vsyncadd [#allocation3], 256  ;;  %s174_s9 = smov [#allocation2]   ;;  %s102_s13 = scalar_lea.hbm %s230_s0, 256 }
   0x4   :  { %s15_s10 = sshll.u32 %s174_s9, 4  ;;  %p103_p0 = scmp.ne.s32.totalorder %s230_s0, %s102_s13  ;;  %s16_s10 = int_to_ptr.vmem [resolvable:$true] %s15_s10 }
   0x5   :  { %p106_p1 = scmp.lt.u32.totalorder %s102_s13, %s230_s0 }
   0x7   :  { %p108_p2 = pnand %p106_p1, %p103_p0 }
   0x9   :  { %111 = shalt.err (!%p108_p2)
}
   0xa   :  { %s112_s18 = scalar_lea.vmem %s16_s10, 256  ;;  %s116_s19 = scalar_lea.vmem %s16_s10, 512 }
   0xb   :  { %p113_p3 = scmp.ne.s32.totalorder %s16_s10, %s112_s18  ;;  %p117_p4 = scmp.lt.s32.totalorder %s16_s10, %s16_s10 }
   0xc   :  { %p118_p5 = scmp.lt.s32.totalorder %s116_s19, %s112_s18 }
   0xe   :  { %p119_p6 = por %p118_p5, %p117_p4 }
  0x10   :  { %p120_p7 = pnand %p119_p6, %p113_p3 }
  0x12   :  { %123 = shalt.err (!%p120_p7)
}
  0x13   :  { %s175_s20 = smov 128   ;;  %s176_s21 = smov 8  }
  0x14   :  { %21 = dma.hbm_to_vmem [thread:$0]  %s230_s0, 256, %s16_s10, [#allocation3], %s175_s20, %s175_s20, %s176_s21  }
  0x15   :  { %26 = vsyncadd [#allocation6], 256  ;;  %s177_s24 = smov [#allocation5]   ;;  %s124_s28 = scalar_lea.hbm %s231_s1, 256 }
  0x16   :  { %s27_s25 = sshll.u32 %s177_s24, 4  ;;  %p125_p8 = scmp.ne.s32.totalorder %s231_s1, %s124_s28  ;;  %s28_s25 = int_to_ptr.vmem [resolvable:$true] %s27_s25 }
  0x17   :  { %p128_p9 = scmp.lt.u32.totalorder %s124_s28, %s231_s1 }
  0x19   :  { %p130_p10 = pnand %p128_p9, %p125_p8 }
  0x1b   :  { %133 = shalt.err (!%p130_p10)
}
  0x1c   :  { %s134_s5 = scalar_lea.vmem %s28_s25, 256  ;;  %s138_s0 = scalar_lea.vmem %s28_s25, 512 }
  0x1d   :  { %p135_p11 = scmp.ne.s32.totalorder %s28_s25, %s134_s5  ;;  %p139_p12 = scmp.lt.s32.totalorder %s28_s25, %s28_s25 }
  0x1e   :  { %p140_p13 = scmp.lt.s32.totalorder %s138_s0, %s134_s5 }
  0x20   :  { %p141_p0 = por %p140_p13, %p139_p12 }
  0x22   :  { %p142_p1 = pnand %p141_p0, %p135_p11 }
  0x24   :  { %145 = shalt.err (!%p142_p1)
}
  0x25   :  { %33 = dma.hbm_to_vmem [thread:$0]  %s231_s1, 256, %s28_s25, [#allocation6], %s175_s20, %s175_s20, %s176_s21  }
  0x26   :  { %168 = dma.done.wait [#allocation3], 512  }
  0x27   :  { %169 = vsyncadd [#allocation3], 4294966784 }
  0x28   :  { %170 = dma.done.wait [#allocation6], 512  }
  0x29   :  { %171 = vsyncadd [#allocation6], 4294966784  ;;  %v45_v0 = vld [vmem:[#allocation2] sm:$0xff]  ;;  %v46_v1 = vld [vmem:[#allocation2 + $0x8] sm:$0xff]  ;;  %s178_s8 = smov [#allocation7]  }
  0x2a   :  { %v49_v2 = vld [vmem:[#allocation5] sm:$0xff]  ;;  %v50_v3 = vld [vmem:[#allocation5 + $0x8] sm:$0xff]  ;;  %s86_s9 = sshll.u32 %s178_s8, 4  ;;  %s87_s9 = int_to_ptr.vmem [resolvable:$true] %s86_s9 }
  0x2b   :  { %v53_v4 = vsub.f32 %v45_v0, %v49_v2  ;;  %v54_v5 = vsub.f32 %v46_v1, %v50_v3  ;;  %s146_s10 = scalar_lea.vmem %s87_s9, 128  ;;  %p151_p3 = scmp.lt.s32.totalorder %s87_s9, %s87_s9 }
  0x2c   :  { %p147_p2 = scmp.ne.s32.totalorder %s87_s9, %s146_s10  ;;  %p152_p4 = scmp.lt.s32.totalorder %s146_s10, %s146_s10 }
  0x2d   :  { %v57_v6 = vmul.f32 %v53_v4, %v53_v4  ;;  %v58_v7 = vmul.f32 %v54_v5, %v54_v5 }
  0x2e   :  { %p153_p5 = por %p152_p4, %p151_p3 }
  0x2f   :  { %v75_v8 = vadd.f32 %v58_v7, %v57_v6 }
  0x30   :  { %p154_p6 = pnand %p153_p5, %p147_p2 }
  0x31   :  { %79 = vst [vmem:[#allocation7] sm:$0xff] %v75_v8 }
  0x32   :  { %157 = shalt.err (!%p154_p6)
}
  0x33   :  { %s158_s12 = scalar_lea.hbm %s232_s2, 128 }
  0x34   :  { %p159_p7 = scmp.ne.s32.totalorder %s232_s2, %s158_s12  ;;  %p162_p8 = scmp.lt.u32.totalorder %s158_s12, %s232_s2 }
  0x36   :  { %p164_p9 = pnand %p162_p8, %p159_p7 }
  0x38   :  { %167 = shalt.err (!%p164_p9)
}
  0x39   :  { %89 = dma.vmem_to_hbm [thread:$0]  %s87_s9, 128, %s232_s2, [#allocation4]  }
  0x3a   :  { %172 = dma.done.wait [#allocation4], 128  }
  0x3b   :  { %173 = vsyncadd [#allocation4], 4294967168 }
  0x3c   :  { %93 = vsyncpa [#allocation3], 1 }
  0x3d   :  { %94 = vsyncpa [#allocation6], 1 }
  0x3e   :  { %95 = vsyncpa [#allocation4], 1 }

</bundles_post_ra>
